<compile_context>
chip_gen: v7x
topology: tpu7x:2x2x1
jax: 0.10.0
libtpu: 0.0.40
codegen_flags: <defaults>
</compile_context>

<pallas_src>
import jax
import jax.numpy as jnp
import numpy as np
from jax.experimental import pallas as pl
from jax.experimental.pallas import tpu as pltpu


def _precompute_kernel(h_ref, w13_ref, w23_ref, b_ref, a_ref, c_ref):
    """Per-token terms: A = h @ (W1+W3), C = h @ (W2-W3) + b  (f32 accumulation)."""
    hf = h_ref[...]                                   # (N*B, H), compute dtype
    a_ref[...] = jnp.dot(hf, w13_ref[...],
                         preferred_element_type=jnp.float32).astype(a_ref.dtype)
    c_ref[...] = (jnp.dot(hf, w23_ref[...],
                          preferred_element_type=jnp.float32)
                  + b_ref[...]).astype(c_ref.dtype)


def _make_span_kernel(P, B):
    """Blocked pair kernel: processes P spans per grid step."""

    def kernel(i_idx_ref, j_idx_ref,          # scalar-prefetched SMEM index tables
               h_ref, a_ref, c_ref, w4_ref,   # VMEM-resident inputs (N,B,H)/(H,H)
               o_ref,                         # (P*B, H) output tile
               had_ref, lin_ref):             # VMEM scratch slabs (P*B, H)
        base = pl.program_id(0) * P
        # Gather this block's P (i, j) pairs into contiguous (P*B, H) slabs.
        # Static slices (p is a Python int) -> no dynamic sublane offsets.
        for p in range(P):
            i = i_idx_ref[base + p]
            j = j_idx_ref[base + p]
            had_ref[p * B:(p + 1) * B, :] = h_ref[i] * h_ref[j]      # Hadamard term
            lin_ref[p * B:(p + 1) * B, :] = a_ref[i] + c_ref[j]      # linear terms (+bias)
        # One batched MXU matmul for the whole block of spans.
        prod = jnp.dot(had_ref[...], w4_ref[...],
                       preferred_element_type=jnp.float32)           # (P*B, H) f32
        o_ref[...] = jnp.tanh(prod + lin_ref[...]).astype(o_ref.dtype)

    return kernel


def span_information_collecting_layer(h, weight, bias, *,
                                      spans_per_block=64,
                                      compute_dtype=None):
    """h: (B, N, H); weight: (H, 4H) as in nn.Linear(4H, H); bias: (H,).

    compute_dtype: dtype of the MXU operands (e.g. jnp.bfloat16 on v6e/v7x).
    Accumulation, bias add and tanh are always f32; output dtype matches h.
    """
    B, N, H = h.shape
    M = N * (N + 1) // 2
    out_dtype = h.dtype
    if compute_dtype is None:
        compute_dtype = h.dtype

    # ---- Factor the linear layer:  feat @ W.T + b = hi@(W1+W3) + hj@(W2-W3) + (hi*hj)@W4 + b
    w_t = weight.T.astype(jnp.float32)                       # (4H, H)
    w1, w2, w3, w4 = (w_t[0:H], w_t[H:2 * H], w_t[2 * H:3 * H], w_t[3 * H:4 * H])
    w13 = (w1 + w3).astype(compute_dtype)                    # (H, H)
    w23 = (w2 - w3).astype(compute_dtype)                    # (H, H)
    w4 = w4.astype(compute_dtype)                            # (H, H)
    b2 = bias.reshape(1, H).astype(jnp.float32)              # (1, H)

    # Token-major layout so kernels can index rows dynamically: (N, B, H).
    h_nbh = jnp.transpose(h, (1, 0, 2)).astype(compute_dtype)
    h_flat = h_nbh.reshape(N * B, H)

    # ---- Kernel 1: per-token A / C (two (N*B,H)@(H,H) matmuls, bias folded into C).
    a_flat, c_flat = pl.pallas_call(
        _precompute_kernel,
        out_shape=(jax.ShapeDtypeStruct((N * B, H), jnp.float32),
                   jax.ShapeDtypeStruct((N * B, H), jnp.float32)),
        in_specs=[pl.BlockSpec(memory_space=pltpu.MemorySpace.VMEM)] * 4,
        out_specs=(pl.BlockSpec(memory_space=pltpu.MemorySpace.VMEM),
                   pl.BlockSpec(memory_space=pltpu.MemorySpace.VMEM)),
    )(h_flat, w13, w23, b2)
    a_nbh = a_flat.reshape(N, B, H)
    c_nbh = c_flat.reshape(N, B, H)

    # ---- Span (i, j) index tables (same order as the PyTorch double loop).
    ii, jj = np.triu_indices(N)
    assert ii.shape[0] == M
    P = max(1, min(int(spans_per_block), M))
    while (P * B) % 8 != 0:        # keep the (P*B, H) output tile sublane-aligned
        P += 1
    num_blocks = -(-M // P)
    m_pad = num_blocks * P
    pad = m_pad - M                # padded spans reuse pair (0, 0); dropped below
    i_idx = jnp.asarray(np.concatenate([ii, np.zeros(pad, ii.dtype)]), jnp.int32)
    j_idx = jnp.asarray(np.concatenate([jj, np.zeros(pad, jj.dtype)]), jnp.int32)

    # ---- Kernel 2: blocked pair kernel over span blocks.
    out_flat = pl.pallas_call(
        _make_span_kernel(P, B),
        out_shape=jax.ShapeDtypeStruct((m_pad * B, H), out_dtype),
        grid_spec=pltpu.PrefetchScalarGridSpec(
            num_scalar_prefetch=2,
            grid=(num_blocks,),
            in_specs=[
                pl.BlockSpec((N, B, H), lambda g, *_: (0, 0, 0)),   # h  (VMEM resident)
                pl.BlockSpec((N, B, H), lambda g, *_: (0, 0, 0)),   # A
                pl.BlockSpec((N, B, H), lambda g, *_: (0, 0, 0)),   # C
                pl.BlockSpec((H, H), lambda g, *_: (0, 0)),         # W4
            ],
            out_specs=pl.BlockSpec((P * B, H), lambda g, *_: (g, 0)),
            scratch_shapes=[
                pltpu.VMEM((P * B, H), compute_dtype),   # Hadamard slab
                pltpu.VMEM((P * B, H), jnp.float32),     # A[i] + C[j] slab
            ],
        ),
        compiler_params=pltpu.CompilerParams(
            # Span blocks are independent -> shard across TensorCores on v7x.
            dimension_semantics=("parallel",),
        ),
    )(i_idx, j_idx, h_nbh, a_nbh, c_nbh, w4)

    out = out_flat.reshape(m_pad, B, H)[:M]        # drop padded spans
    return jnp.transpose(out, (1, 0, 2))           # (B, M, H)


def _reference(h, weight, bias):
    """Pure-JAX reference matching the PyTorch forward exactly."""
    B, N, H = h.shape
    spans = []
    for i in range(N):
        for j in range(i, N):
            hi = h[:, i, :]
            hj = h[:, j, :]
            feat = jnp.concatenate([hi, hj, hi - hj, hi * hj], axis=-1)
            spans.append(feat @ weight.T + bias)
    return jnp.tanh(jnp.stack(spans, axis=1))


if __name__ == "__main__":
    B, N, H = 2, 8, 32          # batch, seq, hidden
    M = N * (N + 1) // 2

    key = jax.random.PRNGKey(0)
    k_h, k_w, k_b = jax.random.split(key, 3)

    h = jax.random.normal(k_h, (B, N, H), dtype=jnp.float32)

    # Deterministic nn.Linear(4H, H)-style init (uniform in +/- 1/sqrt(fan_in)).
    fan_in = 4 * H
    bound = 1.0 / jnp.sqrt(jnp.float32(fan_in))
    weight = jax.random.uniform(k_w, (H, 4 * H), jnp.float32, -bound, bound)
    bias = jax.random.uniform(k_b, (H,), jnp.float32, -bound, bound)

    ref = _reference(h, weight, bias)

    # f32 path (exact semantics); small spans_per_block to exercise grid + padding.
    out = span_information_collecting_layer(h, weight, bias, spans_per_block=16)
    out = jax.block_until_ready(out)
    assert out.shape == (B, M, H), out.shape
    assert jnp.allclose(out, ref, atol=1e-5, rtol=1e-5), "f32 mismatch vs reference"

    # bf16 MXU path (v6e/v7x): f32 accumulation bounds the error; relaxed tolerance.
    out_bf16 = span_information_collecting_layer(
        h, weight, bias, spans_per_block=16, compute_dtype=jnp.bfloat16)
    out_bf16 = jax.block_until_ready(out_bf16)
    assert out_bf16.shape == (B, M, H), out_bf16.shape
    assert jnp.allclose(out_bf16, ref, atol=1e-1, rtol=1e-1), "bf16 mismatch vs reference"

    print("KERNEL_OK")
</pallas_src>

<mosaic_0001>
module attributes {stable_mosaic.version = 11 : i64} {
  func.func @_precompute_kernel(%arg0: memref<16x32xf32, #tpu.memory_space<vmem>>, %arg1: memref<32x32xf32, #tpu.memory_space<vmem>>, %arg2: memref<32x32xf32, #tpu.memory_space<vmem>>, %arg3: memref<1x32xf32, #tpu.memory_space<vmem>>, %arg4: memref<16x32xf32, #tpu.memory_space<vmem>>, %arg5: memref<16x32xf32, #tpu.memory_space<vmem>>) attributes {dimension_semantics = [], scalar_prefetch = 0 : i64, scratch_operands = 0 : i64, tpu.core_type = #tpu.core_type<tc>} {
    %c0 = arith.constant 0 : index
    %c0_0 = arith.constant 0 : index
    %0 = vector.load %arg0[%c0, %c0_0] : memref<16x32xf32, #tpu.memory_space<vmem>>, vector<16x32xf32>
    %c0_1 = arith.constant 0 : index
    %c0_2 = arith.constant 0 : index
    %1 = vector.load %arg1[%c0_1, %c0_2] : memref<32x32xf32, #tpu.memory_space<vmem>>, vector<32x32xf32>
    %cst = arith.constant dense<0.000000e+00> : vector<16x32xf32>
    %2 = tpu.matmul %0, %1, %cst {dimension_numbers = #tpu.dot_dimension_numbers<[1], [0], [0], [1], [0, 0, 1, 1], [], []>} : vector<16x32xf32>, vector<32x32xf32>, vector<16x32xf32> -> vector<16x32xf32>
    %c0_3 = arith.constant 0 : index
    %c0_4 = arith.constant 0 : index
    %3 = vector.load %arg4[%c0_3, %c0_4] : memref<16x32xf32, #tpu.memory_space<vmem>>, vector<16x32xf32>
    tpu.vector_store %arg4[%c0_3, %c0_4], %2 {strides = array<i32>} : memref<16x32xf32, #tpu.memory_space<vmem>>, vector<16x32xf32>,
    %c0_5 = arith.constant 0 : index
    %c0_6 = arith.constant 0 : index
    %4 = vector.load %arg2[%c0_5, %c0_6] : memref<32x32xf32, #tpu.memory_space<vmem>>, vector<32x32xf32>
    %cst_7 = arith.constant dense<0.000000e+00> : vector<16x32xf32>
    %5 = tpu.matmul %0, %4, %cst_7 {dimension_numbers = #tpu.dot_dimension_numbers<[1], [0], [0], [1], [0, 0, 1, 1], [], []>} : vector<16x32xf32>, vector<32x32xf32>, vector<16x32xf32> -> vector<16x32xf32>
    %c0_8 = arith.constant 0 : index
    %c0_9 = arith.constant 0 : index
    %6 = vector.load %arg3[%c0_8, %c0_9] : memref<1x32xf32, #tpu.memory_space<vmem>>, vector<1x32xf32>
    %7 = vector.broadcast %6 : vector<1x32xf32> to vector<16x32xf32>
    %8 = arith.addf %5, %7 : vector<16x32xf32>
    %c0_10 = arith.constant 0 : index
    %c0_11 = arith.constant 0 : index
    %9 = vector.load %arg5[%c0_10, %c0_11] : memref<16x32xf32, #tpu.memory_space<vmem>>, vector<16x32xf32>
    tpu.vector_store %arg5[%c0_10, %c0_11], %8 {strides = array<i32>} : memref<16x32xf32, #tpu.memory_space<vmem>>, vector<16x32xf32>,
    return
  }
}

</mosaic_0001>

<bundles_post_ra>
// kernel: tpu_custom_call.1
= control target key start
LH: loop header
LB: loop body
LE: loop exit
PB: predicated region body
PF: predicated region fallthrough
CT: control target
= control target key end

     0   :  { %11 = vsyncpa [#allocation3], 0  ;;  %s591_s0 = inlined_call_operand.hbm [shape: f32[16,32], index: 0, kind: input, shape index: {}]   ;;  %s592_s1 = inlined_call_operand.hbm [shape: f32[32,32], index: 1, kind: input, shape index: {}]   ;;  %s593_s2 = inlined_call_operand.hbm [shape: f32[32,32], index: 2, kind: input, shape index: {}]   ;;  %s594_s3 = inlined_call_operand.vmem [shape: f32[1,32], index: 3, kind: input, shape index: {}]   ;;  %s595_s4 = inlined_call_operand.hbm [shape: f32[16,32], index: 4, kind: output, shape index: {0}]   ;;  %s596_s5 = inlined_call_operand.hbm [shape: f32[16,32], index: 5, kind: output, shape index: {1}]  }
   0x1   :  { %12 = vsyncpa [#allocation6], 0 }
   0x2   :  { %13 = vsyncpa [#allocation4], 0 }
   0x3   :  { %14 = vsyncpa [#allocation10], 0  ;;  %s454_s18 = smov [#allocation5]   ;;  %s455_s20 = smov [#allocation2]  }
   0x4   :  { %s32_s19 = sshll.u32 %s454_s18, 4  ;;  %s20_s21 = sshll.u32 %s455_s20, 4  ;;  %s33_s19 = int_to_ptr.vmem [resolvable:$true] %s32_s19  ;;  %s491_s21 = int_to_ptr.vmem [resolvable:$true] %s20_s21 }
   0x5   :  { %s336_s24 = scalar_lea.hbm %s592_s1, 512 }
   0x6   :  { %p337_p0 = scmp.ne.s32.totalorder %s592_s1, %s336_s24  ;;  %p340_p1 = scmp.lt.u32.totalorder %s336_s24, %s592_s1 }
   0x8   :  { %p342_p2 = pnand %p340_p1, %p337_p0 }
   0xa   :  { %345 = shalt.err (!%p342_p2)
}
   0xb   :  { %s346_s29 = scalar_lea.vmem %s33_s19, 512  ;;  %p351_p4 = scmp.lt.s32.totalorder %s33_s19, %s33_s19 }
   0xc   :  { %p347_p3 = scmp.ne.s32.totalorder %s33_s19, %s346_s29  ;;  %p352_p5 = scmp.lt.s32.totalorder %s346_s29, %s346_s29 }
   0xe   :  { %p353_p6 = por %p352_p5, %p351_p4 }
  0x10   :  { %p354_p7 = pnand %p353_p6, %p347_p3 }
  0x12   :  { %357 = shalt.err (!%p354_p7)
}
  0x13   :  { %s456_s30 = smov 128   ;;  %s457_s6 = smov 8  }
  0x14   :  { %38 = dma.hbm_to_vmem [thread:$0]  %s592_s1, 512, %s33_s19, [#allocation6], %s456_s30, %s456_s30, %s457_s6  }
  0x15   :  { %s358_s11 = scalar_lea.hbm %s591_s0, 256 }
  0x16   :  { %p359_p8 = scmp.ne.s32.totalorder %s591_s0, %s358_s11  ;;  %p362_p9 = scmp.lt.u32.totalorder %s358_s11, %s591_s0 }
  0x18   :  { %p364_p10 = pnand %p362_p9, %p359_p8 }
  0x1a   :  { %367 = shalt.err (!%p364_p10)
}
  0x1b   :  { %s368_s16 = scalar_lea.vmem %s491_s21, 256  ;;  %p373_p12 = scmp.lt.s32.totalorder %s491_s21, %s491_s21 }
  0x1c   :  { %p369_p11 = scmp.ne.s32.totalorder %s491_s21, %s368_s16  ;;  %p374_p13 = scmp.lt.s32.totalorder %s368_s16, %s368_s16 }
  0x1e   :  { %p375_p0 = por %p374_p13, %p373_p12 }
  0x20   :  { %p376_p1 = pnand %p375_p0, %p369_p11 }
  0x22   :  { %379 = shalt.err (!%p376_p1)
}
  0x23   :  { %26 = dma.hbm_to_vmem [thread:$0]  %s591_s0, 256, %s491_s21, [#allocation3], %s456_s30, %s456_s30, %s457_s6  }
  0x24   :  { %s458_s18 = smov [#allocation7]   ;;  %s380_s23 = scalar_lea.hbm %s593_s2, 512 }
  0x25   :  { %s44_s19 = sshll.u32 %s458_s18, 4  ;;  %p381_p2 = scmp.ne.s32.totalorder %s593_s2, %s380_s23  ;;  %s45_s19 = int_to_ptr.vmem [resolvable:$true] %s44_s19 }
  0x26   :  { %p384_p3 = scmp.lt.u32.totalorder %s380_s23, %s593_s2 }
  0x28   :  { %p386_p4 = pnand %p384_p3, %p381_p2 }
  0x2a   :  { %389 = shalt.err (!%p386_p4)
}
  0x2b   :  { %s390_s28 = scalar_lea.vmem %s45_s19, 512  ;;  %p395_p6 = scmp.lt.s32.totalorder %s45_s19, %s45_s19 }
  0x2c   :  { %p391_p5 = scmp.ne.s32.totalorder %s45_s19, %s390_s28  ;;  %p396_p7 = scmp.lt.s32.totalorder %s390_s28, %s390_s28 }
  0x2e   :  { %p397_p8 = por %p396_p7, %p395_p6 }
  0x30   :  { %p398_p9 = pnand %p397_p8, %p391_p5 }
  0x32   :  { %401 = shalt.err (!%p398_p9)
}
  0x33   :  { %50 = dma.hbm_to_vmem [thread:$0]  %s593_s2, 512, %s45_s19, [#allocation6], %s456_s30, %s456_s30, %s457_s6  }
  0x34   :  { %446 = dma.done.wait [#allocation3], 256  }
  0x35   :  { %447 = vsyncadd [#allocation3], 4294967040 }
  0x36   :  { %448 = dma.done.wait [#allocation6], 1024  }
  0x37   :  { %449 = vsyncadd [#allocation6], 4294966272  ;;  %v152_v0 = vld [vmem:[#allocation7] sm:$0xff]  ;;  %v153_v1 = vld [vmem:[#allocation7 + $0x8] sm:$0xff]  ;;  %vm68_vm0 = vcmask 261120   ;;  %s459_s7 = smov [#allocation8]  }
  0x38   :  { %v64_v2 = vld [vmem:[#allocation5] sm:$0xff]  ;;  %v321_v3 = vpack.c.bf16 %v153_v1, %v152_v0  ;;  %v65_v4 = vld [vmem:[#allocation5 + $0x8] sm:$0xff]  ;;  %v154_v5 = vld [vmem:[#allocation7 + $0x10] sm:$0xff]  ;;  %s245_s8 = sshll.u32 %s459_s7, 4  ;;  %s460_s9 = smov [#allocation9]   ;;  %s246_s8 = int_to_ptr.vmem [resolvable:$true] %s245_s8 }
  0x39   :  { %v155_v6 = vld [vmem:[#allocation7 + $0x18] sm:$0xff]  ;;  %v313_v7 = vpack.c.bf16 %v65_v4, %v64_v2  ;;  %v66_v9 = vld [vmem:[#allocation5 + $0x10] sm:$0xff]  ;;  %s257_s10 = sshll.u32 %s460_s9, 4  ;;  %p407_p11 = scmp.lt.s32.totalorder %s246_s8, %s246_s8  ;;  %s551_s10 = int_to_ptr.vmem [resolvable:$true] %s257_s10 }
  0x3a   :  { %v325_v8 = vpack.c.bf16 %v155_v6, %v154_v5  ;;  %v67_v10 = vld [vmem:[#allocation5 + $0x18] sm:$0xff]  ;;  %v62_v11 = vld [vmem:[#allocation2] sm:$0xff]  ;;  %322 = vmatprep.subr.bf16.mxu1 %v321_v3 }
  0x3b   :  { %v317_v12 = vpack.c.bf16 %v67_v10, %v66_v9  ;;  %310 = vmatprep.mubr.msk.f32.mxu1 %vm68_vm0, %v62_v11  ;;  %314 = vmatprep.subr.bf16.mxu0 %v313_v7  ;;  %v63_v13 = vld [vmem:[#allocation2 + $0x8] sm:$0xff]  ;;  %v276_v14 = vld [vmem:[%s594_s3] ss:$0 sm:$0xff]  ;;  %s402_s3 = scalar_lea.vmem %s246_s8, 256 }
  0x3c   :  { %324 = vmatpush3.bf16.msra.mxu1 %v321_v3  ;;  %316 = vmatpush3.bf16.msra.mxu0 %v313_v7  ;;  %p403_p10 = scmp.ne.s32.totalorder %s246_s8, %s402_s3  ;;  %p408_p12 = scmp.lt.s32.totalorder %s402_s3, %s402_s3 }
  0x3d   :  { %326 = vmatprep.subr.bf16.mxu1 %v325_v8  ;;  %318 = vmatprep.subr.bf16.mxu0 %v317_v12 }
  0x3e   :  { %299 = vmatprep.mubr.msk.f32.mxu0 %vm68_vm0, %v62_v11  ;;  %p409_p13 = por %p408_p12, %p407_p11 }
  0x40   :  { %328 = vmatpush3.bf16.msra.mxu1 %v325_v8  ;;  %320 = vmatpush3.bf16.msra.mxu0 %v317_v12  ;;  %p410_p0 = pnand %p409_p13, %p403_p10 }
  0x43   :  { %311 = vmatmul.mubr.msk.f32.vlgmr.msra.gmra.mrb[0].mxu1 %vm68_vm0, %v63_v13  ;;  %300 = vmatmul.mubr.msk.f32.vlgmr.msra.gmra.mrb[0].mxu0 %vm68_vm0, %v63_v13 }
 0x116   :  { %v312_v15 = vpop.f32.mrb[0].mxu1  ;;  %v301_v17 = vpop.f32.mrb[0].mxu0 }
 0x117   :  { %v235_v16 = vadd.f32 %v312_v15, %v276_v14  ;;  %v229_v18 = vpop.f32.mrb[1].mxu1  ;;  %151 = vst.msk [vmem:[#allocation8 + $0x8] sm:$0xff] %vm68_vm0, %v301_v17  ;;  %v141_v20 = vpop.f32.mrb[1].mxu0 }
 0x118   :  { %v230_v19 = vadd.f32 %v276_v14, %v229_v18  ;;  %150 = vst.msk [vmem:[#allocation8] sm:$0xff] %vm68_vm0, %v141_v20 }
 0x119   :  { %239 = vst.msk [vmem:[#allocation9 + $0x8] sm:$0xff] %vm68_vm0, %v235_v16 }
 0x11a   :  { %238 = vst.msk [vmem:[#allocation9] sm:$0xff] %vm68_vm0, %v230_v19 }
 0x11b   :  { %413 = shalt.err (!%p410_p0)
}
 0x11c   :  { %s414_s13 = scalar_lea.hbm %s595_s4, 256 }
 0x11d   :  { %p415_p1 = scmp.ne.s32.totalorder %s595_s4, %s414_s13  ;;  %p418_p2 = scmp.lt.u32.totalorder %s414_s13, %s595_s4 }
 0x11f   :  { %p420_p3 = pnand %p418_p2, %p415_p1 }
 0x121   :  { %423 = shalt.err (!%p420_p3)
}
 0x122   :  { %251 = dma.vmem_to_hbm [thread:$0]  %s246_s8, 256, %s595_s4, [#allocation4], %s456_s30, %s456_s30, %s457_s6  }
 0x123   :  { %s424_s19 = scalar_lea.vmem %s551_s10, 256  ;;  %p429_p5 = scmp.lt.s32.totalorder %s551_s10, %s551_s10 }
 0x124   :  { %p425_p4 = scmp.ne.s32.totalorder %s551_s10, %s424_s19  ;;  %p430_p6 = scmp.lt.s32.totalorder %s424_s19, %s424_s19 }
 0x126   :  { %p431_p7 = por %p430_p6, %p429_p5 }
 0x128   :  { %p432_p8 = pnand %p431_p7, %p425_p4 }
 0x12a   :  { %435 = shalt.err (!%p432_p8)
}
 0x12b   :  { %s436_s23 = scalar_lea.hbm %s596_s5, 256 }
 0x12c   :  { %p437_p9 = scmp.ne.s32.totalorder %s596_s5, %s436_s23  ;;  %p440_p10 = scmp.lt.u32.totalorder %s436_s23, %s596_s5 }
 0x12e   :  { %p442_p11 = pnand %p440_p10, %p437_p9 }
 0x130   :  { %445 = shalt.err (!%p442_p11)
}
 0x131   :  { %263 = dma.vmem_to_hbm [thread:$0]  %s551_s10, 256, %s596_s5, [#allocation10], %s456_s30, %s456_s30, %s457_s6  }
 0x132   :  { %450 = dma.done.wait [#allocation4], 256  }
 0x133   :  { %451 = vsyncadd [#allocation4], 4294967040 }
 0x134   :  { %452 = dma.done.wait [#allocation10], 256  }
 0x135   :  { %453 = vsyncadd [#allocation10], 4294967040 }
 0x136   :  { %270 = vsyncpa [#allocation3], 1 }
 0x137   :  { %271 = vsyncpa [#allocation6], 1 }
 0x138   :  { %272 = vsyncpa [#allocation4], 1 }
 0x139   :  { %273 = vsyncpa [#allocation10], 1 }

</bundles_post_ra>
